<compile_context>
chip_gen: v7x
topology: tpu7x:2x2x1
jax: 0.10.0
libtpu: 0.0.40
codegen_flags: <defaults>
</compile_context>

<pallas_src>
import jax
import jax.numpy as jnp
from jax.experimental import pallas as pl
from jax.experimental.pallas import tpu as pltpu

IN_FEATURES = 20
OUT_FEATURES = 10

# Scoped-VMEM limit: safe on every generation (<= physical 64 MiB on v7x,
# raises v5e's 16 MiB default, equals v6e/v7x default).
_VMEM_LIMIT_BYTES = 32 << 20


def _linear_kernel(x_ref, wt_ref, b_ref, o_ref):
    # x_ref: (B, IN), wt_ref: (IN, OUT) pre-transposed, b_ref: (1, OUT), o_ref: (B, OUT)
    # Operands go straight to the MXU, f32 accumulation; no in-kernel relayout.
    y = jnp.dot(x_ref[...], wt_ref[...], preferred_element_type=jnp.float32)
    o_ref[...] = (y + b_ref[...]).astype(o_ref.dtype)


def _cost(batch, itemsize):
    return pl.CostEstimate(
        flops=2 * batch * IN_FEATURES * OUT_FEATURES,
        transcendentals=0,
        bytes_accessed=(batch * IN_FEATURES
                        + IN_FEATURES * OUT_FEATURES
                        + OUT_FEATURES
                        + batch * OUT_FEATURES) * itemsize,
    )


def _linear_small(x, w_t, bias2d):
    # Overhead-bound path: no grid, no pipeline machinery, single VMEM-resident call.
    # Used for batch <= 2*tile_b; lane-padded x+y footprint is ~1 KiB/row, so even
    # 8192 rows is ~8 MiB and fits comfortably under the 32 MiB scoped limit.
    batch = x.shape[0]
    return pl.pallas_call(
        _linear_kernel,
        out_shape=jax.ShapeDtypeStruct((batch, OUT_FEATURES), x.dtype),
        in_specs=[
            pl.BlockSpec(memory_space=pltpu.MemorySpace.VMEM),
            pl.BlockSpec(memory_space=pltpu.MemorySpace.VMEM),
            pl.BlockSpec(memory_space=pltpu.MemorySpace.VMEM),
        ],
        out_specs=pl.BlockSpec(memory_space=pltpu.MemorySpace.VMEM),
        compiler_params=pltpu.CompilerParams(
            vmem_limit_bytes=_VMEM_LIMIT_BYTES,
        ),
        cost_estimate=_cost(batch, x.dtype.itemsize),
    )(x, w_t, bias2d)


def _linear_tiled(x, w_t, bias2d, tile_b):
    # Large-batch path: tile batch (parallel axis -> both TCs on v7x); weight/bias
    # stay VMEM-resident (their index_map returns the same block every step).
    # Double-buffered footprint at tile_b=4096 is ~8 MiB (lane-padded x+y), safe on
    # all generations including v7x's 64 MiB VMEM.
    batch = x.shape[0]
    return pl.pallas_call(
        _linear_kernel,
        out_shape=jax.ShapeDtypeStruct((batch, OUT_FEATURES), x.dtype),
        grid_spec=pltpu.PrefetchScalarGridSpec(
            num_scalar_prefetch=0,
            grid=(pl.cdiv(batch, tile_b),),
            in_specs=[
                pl.BlockSpec((tile_b, IN_FEATURES), lambda i: (i, 0)),
                pl.BlockSpec((IN_FEATURES, OUT_FEATURES), lambda i: (0, 0)),
                pl.BlockSpec((1, OUT_FEATURES), lambda i: (0, 0)),
            ],
            out_specs=pl.BlockSpec((tile_b, OUT_FEATURES), lambda i: (i, 0)),
        ),
        compiler_params=pltpu.CompilerParams(
            dimension_semantics=("parallel",),
            vmem_limit_bytes=_VMEM_LIMIT_BYTES,
        ),
        cost_estimate=_cost(batch, x.dtype.itemsize),
    )(x, w_t, bias2d)


def linear_pallas(x, weight, bias, *, tile_b=4096):
    # tile_b=4096: large enough that per-tile DMA (~480 KiB) hides the ~0.35 us
    # per-grid-step overhead, small enough (double-buffered ~8 MiB padded) for v7x.
    # Batches up to 2*tile_b take the single-shot grid-less path; above that the
    # grid has >= 3 steps so megacore sharding always has work for both cores.
    w_t = weight.T                      # one-time XLA transpose -> (IN, OUT)
    bias2d = bias.reshape(1, OUT_FEATURES)
    if x.shape[0] <= 2 * tile_b:
        return _linear_small(x, w_t, bias2d)
    return _linear_tiled(x, w_t, bias2d, tile_b)


if __name__ == "__main__":
    key = jax.random.PRNGKey(0)
    k_x, k_w, k_b = jax.random.split(key, 3)

    # Deterministic parameter init (mimics PyTorch U(-1/sqrt(in), 1/sqrt(in)))
    bound = 1.0 / (IN_FEATURES ** 0.5)
    weight = jax.random.uniform(
        k_w, (OUT_FEATURES, IN_FEATURES), jnp.float32, -bound, bound
    )
    bias = jax.random.uniform(k_b, (OUT_FEATURES,), jnp.float32, -bound, bound)

    # Small input consistent with the module: [batch=8, in_features=20]
    x = jax.random.normal(k_x, (8, IN_FEATURES), jnp.float32)

    y = linear_pallas(x, weight, bias)
    jax.block_until_ready(y)

    # Correctness check against plain JAX reference (Linear only; forward applies no ReLU)
    y_ref = x @ weight.T + bias
    assert y.shape == (8, OUT_FEATURES)
    assert jnp.allclose(y, y_ref, atol=1e-5, rtol=1e-5)

    # Also exercise the tiled (large-batch) path once to validate the grid/BlockSpecs,
    # including a ragged last block (rows are independent, so masking is safe).
    xb = jax.random.normal(k_x, (2 * 4096 + 100, IN_FEATURES), jnp.float32)
    yb = linear_pallas(xb, weight, bias)
    jax.block_until_ready(yb)
    yb_ref = xb @ weight.T + bias
    assert yb.shape == (xb.shape[0], OUT_FEATURES)
    assert jnp.allclose(yb, yb_ref, atol=1e-5, rtol=1e-5)

    print("KERNEL_OK")
</pallas_src>

<mosaic_0001>
module attributes {stable_mosaic.version = 11 : i64} {
  func.func @_linear_kernel(%arg0: memref<8x20xf32, #tpu.memory_space<vmem>>, %arg1: memref<20x10xf32, #tpu.memory_space<vmem>>, %arg2: memref<1x10xf32, #tpu.memory_space<vmem>>, %arg3: memref<8x10xf32, #tpu.memory_space<vmem>>) attributes {dimension_semantics = [], scalar_prefetch = 0 : i64, scratch_operands = 0 : i64, tpu.core_type = #tpu.core_type<tc>} {
    %c0 = arith.constant 0 : index
    %c0_0 = arith.constant 0 : index
    %0 = vector.load %arg0[%c0, %c0_0] : memref<8x20xf32, #tpu.memory_space<vmem>>, vector<8x20xf32>
    %c0_1 = arith.constant 0 : index
    %c0_2 = arith.constant 0 : index
    %1 = vector.load %arg1[%c0_1, %c0_2] : memref<20x10xf32, #tpu.memory_space<vmem>>, vector<20x10xf32>
    %cst = arith.constant dense<0.000000e+00> : vector<8x10xf32>
    %2 = tpu.matmul %0, %1, %cst {dimension_numbers = #tpu.dot_dimension_numbers<[1], [0], [0], [1], [0, 0, 1, 1], [], []>} : vector<8x20xf32>, vector<20x10xf32>, vector<8x10xf32> -> vector<8x10xf32>
    %c0_3 = arith.constant 0 : index
    %c0_4 = arith.constant 0 : index
    %3 = vector.load %arg2[%c0_3, %c0_4] : memref<1x10xf32, #tpu.memory_space<vmem>>, vector<1x10xf32>
    %4 = vector.broadcast %3 : vector<1x10xf32> to vector<8x10xf32>
    %5 = arith.addf %2, %4 : vector<8x10xf32>
    %c0_5 = arith.constant 0 : index
    %c0_6 = arith.constant 0 : index
    %6 = vector.load %arg3[%c0_5, %c0_6] : memref<8x10xf32, #tpu.memory_space<vmem>>, vector<8x10xf32>
    tpu.vector_store %arg3[%c0_5, %c0_6], %5 {strides = array<i32>} : memref<8x10xf32, #tpu.memory_space<vmem>>, vector<8x10xf32>,
    return
  }
}

</mosaic_0001>

<bundles_post_ra>
// kernel: tpu_custom_call.1
= control target key start
LH: loop header
LB: loop body
LE: loop exit
PB: predicated region body
PF: predicated region fallthrough
CT: control target
= control target key end

     0   :  { %v167_v2 = vmov 0.0|0.0   ;;  %vm168_vm0 = vmmov 0   ;;  %v169_v4 = vmov 0.0   ;;  %s218_s0 = inlined_call_operand.vmem [shape: f32[8,20], index: 0, kind: input, shape index: {}]   ;;  %s219_s1 = inlined_call_operand.vmem [shape: f32[20,10], index: 1, kind: input, shape index: {}]   ;;  %s220_s2 = inlined_call_operand.vmem [shape: f32[1,10], index: 2, kind: input, shape index: {}]   ;;  %s221_s3 = inlined_call_operand.hbm [shape: f32[8,10], index: 3, kind: output, shape index: {}]  }
   0x1   :  { %v16_v0 = vld [vmem:[%s219_s1] sm:$0xff]  ;;  %v17_v1 = vld [vmem:[%s219_s1 + $0x8] sm:$0xff]  ;;  %136 = vmatprep.subr.bf16.mxu0 %v167_v2  ;;  %133 = vmatprep.mubr.msk.f32.mxu0 %vm168_vm0, %v169_v4 }
   0x2   :  { %v137_v3 = vpack.c.bf16 %v17_v1, %v16_v0 }
   0x3   :  { %8 = vsyncpa [#allocation3], 0  ;;  %v18_v5 = vld [vmem:[%s219_s1 + $0x10] sm:$0xf]  ;;  %vm30_vm1 = vcmask 1043456   ;;  %v15_v6 = vld [vmem:[%s218_s0] sm:$0xff] }
   0x4   :  { %138 = vmatpush3.bf16.msra.mxu0 %v137_v3  ;;  %vm26_vm2 = vcmask 162816   ;;  %v120_v7 = vld [vmem:[%s220_s2] ss:$0 sm:$0xff]  ;;  %s170_s22 = smov [#allocation2]   ;;  %vm104_vm3 = vcmask 80896  }
   0x5   :  { %131 = vmatprep.subr.mxu0 %v169_v4  ;;  %s112_s23 = sshll.u32 %s170_s22, 4  ;;  %s113_s23 = int_to_ptr.vmem [resolvable:$true] %s112_s23 }
   0x6   :  { %s143_s1 = scalar_lea.vmem %s113_s23, 128  ;;  %p148_p1 = scmp.lt.s32.totalorder %s113_s23, %s113_s23 }
   0x7   :  { %p144_p0 = scmp.ne.s32.totalorder %s113_s23, %s143_s1  ;;  %p149_p2 = scmp.lt.s32.totalorder %s143_s1, %s143_s1 }
   0x8   :  { %132 = vmatpush3.msk.msra.mxu0 %vm30_vm1, %v18_v5 }
   0x9   :  { %134 = vmatmul.mubr.msk.f32.vlgmr.msra.gmra.mrb[0].mxu0 %vm26_vm2, %v15_v6  ;;  %p150_p3 = por %p149_p2, %p148_p1 }
   0xb   :  { %p151_p4 = pnand %p150_p3, %p144_p0 }
  0xdc   :  { %v100_v8 = vpop.f32.mrb[0].mxu0 }
  0xdd   :  { %v101_v9 = vadd.f32 %v120_v7, %v100_v8  ;;  %v135_v10 = vpop.f32.mrb[1].mxu0 }
  0xdf   :  { %105 = vst.msk [vmem:[#allocation2] sm:$0xff] %vm104_vm3, %v101_v9 }
  0xe0   :  { %154 = shalt.err (!%p151_p4)
}
  0xe1   :  { %s155_s25 = scalar_lea.hbm %s221_s3, 128 }
  0xe2   :  { %p156_p5 = scmp.ne.s32.totalorder %s221_s3, %s155_s25  ;;  %p159_p6 = scmp.lt.u32.totalorder %s155_s25, %s221_s3 }
  0xe4   :  { %p161_p7 = pnand %p159_p6, %p156_p5 }
  0xe6   :  { %164 = shalt.err (!%p161_p7)
}
  0xe7   :  { %115 = dma.vmem_to_hbm [thread:$0]  %s113_s23, 128, %s221_s3, [#allocation3]  }
  0xe8   :  { %165 = dma.done.wait [#allocation3], 128  }
  0xe9   :  { %166 = vsyncadd [#allocation3], 4294967168 }
  0xea   :  { %119 = vsyncpa [#allocation3], 1 }

</bundles_post_ra>
